<compile_context>
chip_gen: v7x
topology: tpu7x:2x2x1
jax: 0.10.0
libtpu: 0.0.40
codegen_flags: <defaults>
</compile_context>

<pallas_src>
import jax
import jax.numpy as jnp
from jax.experimental import pallas as pl
from jax.experimental.pallas import tpu as pltpu


def linear_kernel(wb_ref, x_ref, o_ref):
    # wb_ref: (2,) SMEM scalars [w, b]; x_ref / o_ref: (TM, LANEW) VMEM tiles.
    # Single fused scale+shift over the whole lane-dense tile on the VPU;
    # this is pure filler under the HBM-DMA bottleneck.
    w = wb_ref[0]
    b = wb_ref[1]
    o_ref[...] = x_ref[...] * w + b


def linear_forward(x, weight, bias, *, lanew=512, tm_max=1024):
    """Pallas equivalent of nn.Linear(1, 1).forward.

    x:      (N, 1) float32
    weight: (1, 1) float32   (out_features, in_features)
    bias:   (1,)   float32
    returns (N, 1) float32
    """
    n, in_f = x.shape
    assert in_f == 1 and weight.shape == (1, 1) and bias.shape == (1,)
    dtype = jnp.float32

    # ---- Lane-dense layout plumbing (no extra compute) ---------------------
    xf = x.astype(dtype).reshape(-1)                      # (N,)
    rows_needed = pl.cdiv(n, lanew)                       # >= 1
    # Row-tile: multiple of 8 (sublane), capped so a tile stays <= 2 MiB f32.
    tm = min(tm_max, max(8, ((rows_needed + 7) // 8) * 8))
    rows = pl.cdiv(rows_needed, tm) * tm                  # grid divides evenly
    total_padded = rows * lanew
    x2d = jnp.pad(xf, (0, total_padded - n)).reshape(rows, lanew)

    # Weight + bias packed once into a tiny SMEM operand.
    wb = jnp.concatenate(
        [weight.reshape(1), bias.reshape(1)]).astype(dtype)   # (2,)

    grid = (rows // tm,)

    y2d = pl.pallas_call(
        linear_kernel,
        out_shape=jax.ShapeDtypeStruct((rows, lanew), dtype),
        grid=grid,
        in_specs=[
            # Whole (2,) scalar vector lives in SMEM for the entire grid.
            pl.BlockSpec(memory_space=pltpu.SMEM),
            # Lane-dense streaming tiles, auto double-buffered HBM<->VMEM.
            pl.BlockSpec((tm, lanew), lambda i: (i, 0)),
        ],
        out_specs=pl.BlockSpec((tm, lanew), lambda i: (i, 0)),
        compiler_params=pltpu.CompilerParams(
            dimension_semantics=("parallel",),
        ),
    )(wb, x2d)

    # Undo the layout plumbing: drop padding, restore (N, 1).
    return y2d.reshape(-1)[:n].reshape(n, 1)


if __name__ == "__main__":
    key = jax.random.PRNGKey(0)
    kx, kw, kb = jax.random.split(key, 3)

    # Small deterministic inputs: batch of 8 scalars, as Linear(1, 1) expects.
    x = jax.random.normal(kx, (8, 1), dtype=jnp.float32)
    weight = jax.random.normal(kw, (1, 1), dtype=jnp.float32)
    bias = jax.random.normal(kb, (1,), dtype=jnp.float32)

    y = linear_forward(x, weight, bias)
    y = jax.block_until_ready(y)

    y_ref = x @ weight.T + bias
    assert y.shape == (8, 1)
    assert jnp.allclose(y, y_ref, atol=1e-6), "mismatch vs reference (N=8)"

    # Second check exercising the padding / lane-dense reshape path.
    x2 = jax.random.normal(kx, (1500, 1), dtype=jnp.float32)
    y2 = jax.block_until_ready(linear_forward(x2, weight, bias))
    y2_ref = x2 @ weight.T + bias
    assert y2.shape == (1500, 1)
    assert jnp.allclose(y2, y2_ref, atol=1e-6), "mismatch vs reference (N=1500)"

    print("KERNEL_OK")
</pallas_src>

<mosaic_0001>
module attributes {stable_mosaic.version = 11 : i64} {
  func.func @linear_kernel(%arg0: i32, %arg1: memref<2xf32, #tpu.memory_space<smem>>, %arg2: memref<8x512xf32, #tpu.memory_space<vmem>>, %arg3: memref<8x512xf32, #tpu.memory_space<vmem>>) attributes {dimension_semantics = [#tpu.dimension_semantics<parallel>], iteration_bounds = array<i64: 1>, scalar_prefetch = 0 : i64, scratch_operands = 0 : i64, tpu.core_type = #tpu.core_type<tc>, window_params = [{transform_indices = @transform_0, window_bounds = array<i64: 2>}, {transform_indices = @transform_1, window_bounds = array<i64: 8, 512>}, {transform_indices = @transform_2, window_bounds = array<i64: 8, 512>}]} {
    %c0 = arith.constant 0 : index
    %0 = memref.load %arg1[%c0] : memref<2xf32, #tpu.memory_space<smem>>
    %c1 = arith.constant 1 : index
    %1 = memref.load %arg1[%c1] : memref<2xf32, #tpu.memory_space<smem>>
    %c0_0 = arith.constant 0 : index
    %c0_1 = arith.constant 0 : index
    %2 = vector.load %arg2[%c0_0, %c0_1] : memref<8x512xf32, #tpu.memory_space<vmem>>, vector<8x512xf32>
    %3 = vector.broadcast %0 : f32 to vector<8x512xf32>
    %4 = arith.mulf %2, %3 : vector<8x512xf32>
    %5 = vector.broadcast %1 : f32 to vector<8x512xf32>
    %6 = arith.addf %4, %5 : vector<8x512xf32>
    %c0_2 = arith.constant 0 : index
    %c0_3 = arith.constant 0 : index
    %7 = vector.load %arg3[%c0_2, %c0_3] : memref<8x512xf32, #tpu.memory_space<vmem>>, vector<8x512xf32>
    tpu.vector_store %arg3[%c0_2, %c0_3], %6 {strides = array<i32>} : memref<8x512xf32, #tpu.memory_space<vmem>>, vector<8x512xf32>,
    return
  }
  func.func @transform_0(%arg0: i32) -> i32 {
    %c0_i32 = arith.constant 0 : i32
    %c0_i32_0 = arith.constant 0 : i32
    return %c0_i32 : i32
  }
  func.func @transform_1(%arg0: i32) -> (i32, i32) {
    %c0_i32 = arith.constant 0 : i32
    %c0_i32_0 = arith.constant 0 : i32
    return %arg0, %c0_i32 : i32, i32
  }
  func.func @transform_2(%arg0: i32) -> (i32, i32) {
    %c0_i32 = arith.constant 0 : i32
    %c0_i32_0 = arith.constant 0 : i32
    return %arg0, %c0_i32 : i32, i32
  }
}

</mosaic_0001>

<bundles_post_ra>
// kernel: tpu_custom_call.1
= control target key start
LH: loop header
LB: loop body
LE: loop exit
PB: predicated region body
PF: predicated region fallthrough
CT: control target
= control target key end

     0   :  { %7 = vsyncpa [#allocation5], 0  ;;  %s189_s0 = inlined_call_operand.hbm [shape: f32[2], index: 0, kind: input, shape index: {}]   ;;  %s190_s1 = inlined_call_operand.hbm [shape: f32[8,512], index: 1, kind: input, shape index: {}]   ;;  %s191_s2 = inlined_call_operand.hbm [shape: f32[8,512], index: 2, kind: output, shape index: {}]  }
   0x1   :  { %8 = vsyncpa [#allocation3], 0 }
   0x2   :  { %9 = vsyncpa [#allocation4], 0  ;;  %s75_s11 = scalar_lea.hbm %s189_s0, 16 }
   0x3   :  { %p76_p0 = scmp.ne.s32.totalorder %s189_s0, %s75_s11  ;;  %p79_p1 = scmp.lt.u32.totalorder %s75_s11, %s189_s0 }
   0x5   :  { %p81_p2 = pnand %p79_p1, %p76_p0 }
   0x7   :  { %84 = shalt.err (!%p81_p2)
}
   0x8   :  { %s135_s16 = smov [#allocation2]   ;;  %s136_s19 = smov [#allocation6]  }
   0x9   :  { %17 = dma.hbm_to_smem %s189_s0, 16, %s135_s16, [#allocation5]  }
   0xa   :  { %s24_s20 = sshll.u32 %s136_s19, 4  ;;  %s85_s23 = scalar_lea.hbm %s190_s1, 512  ;;  %s25_s20 = int_to_ptr.vmem [resolvable:$true] %s24_s20 }
   0xb   :  { %p86_p3 = scmp.ne.s32.totalorder %s190_s1, %s85_s23  ;;  %p89_p4 = scmp.lt.u32.totalorder %s85_s23, %s190_s1 }
   0xd   :  { %p91_p5 = pnand %p89_p4, %p86_p3 }
   0xf   :  { %94 = shalt.err (!%p91_p5)
}
  0x10   :  { %s95_s28 = scalar_lea.vmem %s25_s20, 512  ;;  %p100_p7 = scmp.lt.s32.totalorder %s25_s20, %s25_s20 }
  0x11   :  { %p96_p6 = scmp.ne.s32.totalorder %s25_s20, %s95_s28  ;;  %p101_p8 = scmp.lt.s32.totalorder %s95_s28, %s95_s28 }
  0x13   :  { %p102_p9 = por %p101_p8, %p100_p7 }
  0x15   :  { %p103_p10 = pnand %p102_p9, %p96_p6 }
  0x17   :  { %106 = shalt.err (!%p103_p10)
}
  0x18   :  { %27 = dma.hbm_to_vmem [thread:$0]  %s190_s1, 512, %s25_s20, [#allocation3]  }
  0x19   :  { %129 = dma.done.wait [#allocation5], 16  }
  0x1a   :  { %130 = vsyncadd [#allocation5], 4294967280 }
  0x1b   :  { %131 = dma.done.wait [#allocation3], 512  }
  0x1c   :  { %132 = vsyncadd [#allocation3], 4294966784 }
  0x1d   :  { %34 = sfence }
  0x1e   :  { %s35_s30 = sld [smem:[#allocation2]]  ;;  %s71_s3 = sld [smem:[#allocation2 + $0x1]]  ;;  %v37_v0 = vld [vmem:[#allocation6] sm:$0xff]  ;;  %v38_v1 = vld [vmem:[#allocation6 + $0x8] sm:$0xff]  ;;  %v39_v2 = vld [vmem:[#allocation6 + $0x10] sm:$0xff] }
  0x1f   :  { %v40_v3 = vld [vmem:[#allocation6 + $0x18] sm:$0xff]  ;;  %s137_s4 = smov [#allocation7]  }
  0x20   :  { %s61_s5 = sshll.u32 %s137_s4, 4  ;;  %s62_s5 = int_to_ptr.vmem [resolvable:$true] %s61_s5 }
  0x21   :  { %s107_s1 = scalar_lea.vmem %s62_s5, 512  ;;  %p112_p12 = scmp.lt.s32.totalorder %s62_s5, %s62_s5 }
  0x22   :  { %p108_p11 = scmp.ne.s32.totalorder %s62_s5, %s107_s1  ;;  %p113_p13 = scmp.lt.s32.totalorder %s107_s1, %s107_s1 }
  0x24   :  { %v41_v4 = vstv %s35_s30  ;;  %v46_v5 = vstv %s71_s3  ;;  %p114_p0 = por %p113_p13, %p112_p12 }
  0x25   :  { %v42_v6 = vmul.f32 %v41_v4, %v37_v0  ;;  %v43_v7 = vmul.f32 %v41_v4, %v38_v1  ;;  %v44_v8 = vmul.f32 %v41_v4, %v39_v2  ;;  %v45_v9 = vmul.f32 %v41_v4, %v40_v3 }
  0x26   :  { %p115_p1 = pnand %p114_p0, %p108_p11 }
  0x27   :  { %v47_v10 = vadd.f32 %v46_v5, %v42_v6  ;;  %v48_v11 = vadd.f32 %v46_v5, %v43_v7  ;;  %v49_v12 = vadd.f32 %v46_v5, %v44_v8  ;;  %v50_v13 = vadd.f32 %v46_v5, %v45_v9 }
  0x29   :  { %51 = vst [vmem:[#allocation7] sm:$0xff] %v47_v10  ;;  %52 = vst [vmem:[#allocation7 + $0x8] sm:$0xff] %v48_v11 }
  0x2a   :  { %53 = vst [vmem:[#allocation7 + $0x10] sm:$0xff] %v49_v12  ;;  %54 = vst [vmem:[#allocation7 + $0x18] sm:$0xff] %v50_v13 }
  0x2b   :  { %118 = shalt.err (!%p115_p1)
}
  0x2c   :  { %s119_s8 = scalar_lea.hbm %s191_s2, 512 }
  0x2d   :  { %p120_p2 = scmp.ne.s32.totalorder %s191_s2, %s119_s8  ;;  %p123_p3 = scmp.lt.u32.totalorder %s119_s8, %s191_s2 }
  0x2f   :  { %p125_p4 = pnand %p123_p3, %p120_p2 }
  0x31   :  { %128 = shalt.err (!%p125_p4)
}
  0x32   :  { %64 = dma.vmem_to_hbm [thread:$0]  %s62_s5, 512, %s191_s2, [#allocation4]  }
  0x33   :  { %133 = dma.done.wait [#allocation4], 512  }
  0x34   :  { %134 = vsyncadd [#allocation4], 4294966784 }
  0x35   :  { %68 = vsyncpa [#allocation3], 1 }
  0x36   :  { %69 = vsyncpa [#allocation4], 1 }
  0x37   :  { %70 = vsyncpa [#allocation5], 1 }

</bundles_post_ra>
